<compile_context>
chip_gen: v5e
topology: v5e:2x2
jax: 0.10.0
libtpu: 0.0.40
codegen_flags: <defaults>
</compile_context>

<pallas_src>
import math

import jax
import jax.numpy as jnp
from jax.experimental import pallas as pl
from jax.experimental.pallas import tpu as pltpu


_SQRT_HALF = 0.7071067811865476


def _erf_f32(x):
    # Abramowitz & Stegun 7.1.26 rational approximation of erf, |error| < 1.5e-7.
    # Uses only compare/select, polynomials and exp -> always lowers on Mosaic.
    p = 0.3275911
    a1, a2, a3, a4, a5 = (0.254829592, -0.284496736, 1.421413741,
                          -1.453152027, 1.061405429)
    sgn = jnp.where(x >= 0.0, 1.0, -1.0)
    ax = jnp.abs(x)
    t = 1.0 / (1.0 + p * ax)
    poly = ((((a5 * t + a4) * t + a3) * t + a2) * t + a1) * t
    return sgn * (1.0 - poly * jnp.exp(-(ax * ax)))


def _gelu_exact(x):
    # Matches torch.nn.GELU() (exact erf formulation) to ~1e-7.
    return 0.5 * x * (1.0 + _erf_f32(x * _SQRT_HALF))


def _mlp_kernel(x_ref, w1_ref, b1_ref, w2_ref, b2_ref, out_ref):
    x = x_ref[...]                                                     # (TM, C_in)
    h = jnp.dot(x, w1_ref[...], preferred_element_type=jnp.float32) + b1_ref[...]
    h = _gelu_exact(h)                                                 # (TM, Hid)
    # Dropout(p=0) is an identity -> nothing to do.
    out = jnp.dot(h, w2_ref[...], preferred_element_type=jnp.float32) + b2_ref[...]
    out_ref[...] = out.astype(out_ref.dtype)                           # (TM, C_out)


def mlp_pallas(x, w1, b1, w2, b2, *, block_rows=None):
    """x: (..., C_in); w1: (C_in, Hid); b1: (1, Hid); w2: (Hid, C_out); b2: (1, C_out)."""
    *lead, c_in = x.shape
    m = math.prod(lead)
    hid = w1.shape[1]
    c_out = w2.shape[1]

    x2 = x.reshape(m, c_in)
    b1 = b1.reshape(1, hid)
    b2 = b2.reshape(1, c_out)

    if block_rows is None:
        if m <= 8:
            block_rows = m
        else:
            # Split rows into (at least) two tiles so both v7x TensorCores get work,
            # round to the 8-sublane granule, cap the tile for VMEM headroom.
            block_rows = min(512, ((pl.cdiv(m, 2) + 7) // 8) * 8)
    grid = (pl.cdiv(m, block_rows),)

    out = pl.pallas_call(
        _mlp_kernel,
        out_shape=jax.ShapeDtypeStruct((m, c_out), jnp.float32),
        grid_spec=pltpu.PrefetchScalarGridSpec(
            num_scalar_prefetch=0,
            grid=grid,
            in_specs=[
                pl.BlockSpec((block_rows, c_in), lambda i: (i, 0)),    # activations stream
                pl.BlockSpec((c_in, hid), lambda i: (0, 0)),           # fc1 weight (resident)
                pl.BlockSpec((1, hid), lambda i: (0, 0)),              # fc1 bias   (resident)
                pl.BlockSpec((hid, c_out), lambda i: (0, 0)),          # fc2 weight (resident)
                pl.BlockSpec((1, c_out), lambda i: (0, 0)),            # fc2 bias   (resident)
            ],
            out_specs=pl.BlockSpec((block_rows, c_out), lambda i: (i, 0)),
        ),
        compiler_params=pltpu.CompilerParams(
            dimension_semantics=("parallel",)),
    )(x2, w1, b1, w2, b2)
    return out.reshape(*lead, c_out)


def mlp_reference(x, w1, b1, w2, b2):
    """Pure-JAX reference matching the PyTorch forward (dropout = identity)."""
    h = x @ w1 + b1.reshape(-1)
    h = jax.nn.gelu(h, approximate=False)      # exact erf GELU == torch.nn.GELU()
    return h @ w2 + b2.reshape(-1)


if __name__ == "__main__":
    # Small shapes consistent with the module: tokens x = (B, N, C_in),
    # hidden_features = 128 (lane-dense), out_features = C_in.
    B, N, C_IN, HID, C_OUT = 2, 8, 32, 128, 32

    key = jax.random.PRNGKey(0)
    kx, k1, kb1, k2, kb2 = jax.random.split(key, 5)

    x = jax.random.normal(kx, (B, N, C_IN), dtype=jnp.float32)
    # Parameters stored as (in_features, out_features) — i.e. W.T of nn.Linear —
    # with PyTorch-style uniform(-1/sqrt(fan_in), 1/sqrt(fan_in)) init.
    bound1 = 1.0 / math.sqrt(C_IN)
    w1 = jax.random.uniform(k1, (C_IN, HID), jnp.float32, -bound1, bound1)
    b1 = jax.random.uniform(kb1, (1, HID), jnp.float32, -bound1, bound1)
    bound2 = 1.0 / math.sqrt(HID)
    w2 = jax.random.uniform(k2, (HID, C_OUT), jnp.float32, -bound2, bound2)
    b2 = jax.random.uniform(kb2, (1, C_OUT), jnp.float32, -bound2, bound2)

    out = mlp_pallas(x, w1, b1, w2, b2)
    jax.block_until_ready(out)

    ref = mlp_reference(x, w1, b1, w2, b2)
    assert out.shape == ref.shape, (out.shape, ref.shape)
    max_err = float(jnp.max(jnp.abs(out - ref)))
    assert jnp.allclose(out, ref, atol=1e-4, rtol=1e-4), f"mismatch, max err {max_err}"

    print("KERNEL_OK")
</pallas_src>

<mosaic_0001>
module attributes {stable_mosaic.version = 11 : i64} {
  func.func @_mlp_kernel(%arg0: i32, %arg1: memref<8x32xf32, #tpu.memory_space<vmem>>, %arg2: memref<32x128xf32, #tpu.memory_space<vmem>>, %arg3: memref<1x128xf32, #tpu.memory_space<vmem>>, %arg4: memref<128x32xf32, #tpu.memory_space<vmem>>, %arg5: memref<1x32xf32, #tpu.memory_space<vmem>>, %arg6: memref<8x32xf32, #tpu.memory_space<vmem>>) attributes {dimension_semantics = [#tpu.dimension_semantics<parallel>], iteration_bounds = array<i64: 2>, scalar_prefetch = 0 : i64, scratch_operands = 0 : i64, tpu.core_type = #tpu.core_type<tc>, window_params = [{transform_indices = @transform_0, window_bounds = array<i64: 8, 32>}, {pipeline_mode = #tpu.pipeline_mode<synchronous>, transform_indices = @transform_1, window_bounds = array<i64: 32, 128>}, {pipeline_mode = #tpu.pipeline_mode<synchronous>, transform_indices = @transform_2, window_bounds = array<i64: 1, 128>}, {pipeline_mode = #tpu.pipeline_mode<synchronous>, transform_indices = @transform_3, window_bounds = array<i64: 128, 32>}, {pipeline_mode = #tpu.pipeline_mode<synchronous>, transform_indices = @transform_4, window_bounds = array<i64: 1, 32>}, {transform_indices = @transform_5, window_bounds = array<i64: 8, 32>}]} {
    %c0 = arith.constant 0 : index
    %c0_0 = arith.constant 0 : index
    %0 = vector.load %arg1[%c0, %c0_0] : memref<8x32xf32, #tpu.memory_space<vmem>>, vector<8x32xf32>
    %c0_1 = arith.constant 0 : index
    %c0_2 = arith.constant 0 : index
    %1 = vector.load %arg2[%c0_1, %c0_2] : memref<32x128xf32, #tpu.memory_space<vmem>>, vector<32x128xf32>
    %cst = arith.constant dense<0.000000e+00> : vector<8x128xf32>
    %2 = tpu.matmul %0, %1, %cst {dimension_numbers = #tpu.dot_dimension_numbers<[1], [0], [0], [1], [0, 0, 1, 1], [], []>} : vector<8x32xf32>, vector<32x128xf32>, vector<8x128xf32> -> vector<8x128xf32>
    %c0_3 = arith.constant 0 : index
    %c0_4 = arith.constant 0 : index
    %3 = vector.load %arg3[%c0_3, %c0_4] : memref<1x128xf32, #tpu.memory_space<vmem>>, vector<1x128xf32>
    %4 = vector.broadcast %3 : vector<1x128xf32> to vector<8x128xf32>
    %5 = arith.addf %2, %4 : vector<8x128xf32>
    %cst_5 = arith.constant 5.000000e-01 : f32
    %6 = vector.broadcast %cst_5 : f32 to vector<8x128xf32>
    %7 = arith.mulf %6, %5 : vector<8x128xf32>
    %cst_6 = arith.constant 0.707106769 : f32
    %8 = vector.broadcast %cst_6 : f32 to vector<8x128xf32>
    %9 = arith.mulf %5, %8 : vector<8x128xf32>
    %cst_7 = arith.constant 0.000000e+00 : f32
    %10 = vector.broadcast %cst_7 : f32 to vector<8x128xf32>
    %11 = arith.cmpf oge, %9, %10 : vector<8x128xf32>
    %cst_8 = arith.constant 1.000000e+00 : f32
    %cst_9 = arith.constant -1.000000e+00 : f32
    %12 = vector.broadcast %cst_8 : f32 to vector<8x128xf32>
    %13 = vector.broadcast %cst_9 : f32 to vector<8x128xf32>
    %14 = arith.select %11, %12, %13 : vector<8x128xi1>, vector<8x128xf32>
    %15 = math.absf %9 : vector<8x128xf32>
    %cst_10 = arith.constant 0.327591091 : f32
    %16 = vector.broadcast %cst_10 : f32 to vector<8x128xf32>
    %17 = arith.mulf %16, %15 : vector<8x128xf32>
    %cst_11 = arith.constant 1.000000e+00 : f32
    %18 = vector.broadcast %cst_11 : f32 to vector<8x128xf32>
    %19 = arith.addf %18, %17 : vector<8x128xf32>
    %cst_12 = arith.constant 1.000000e+00 : f32
    %20 = vector.broadcast %cst_12 : f32 to vector<8x128xf32>
    %21 = arith.divf %20, %19 : vector<8x128xf32>
    %cst_13 = arith.constant 1.06140542 : f32
    %22 = vector.broadcast %cst_13 : f32 to vector<8x128xf32>
    %23 = arith.mulf %22, %21 : vector<8x128xf32>
    %cst_14 = arith.constant -1.45315206 : f32
    %24 = vector.broadcast %cst_14 : f32 to vector<8x128xf32>
    %25 = arith.addf %23, %24 : vector<8x128xf32>
    %26 = arith.mulf %25, %21 : vector<8x128xf32>
    %cst_15 = arith.constant 1.42141378 : f32
    %27 = vector.broadcast %cst_15 : f32 to vector<8x128xf32>
    %28 = arith.addf %26, %27 : vector<8x128xf32>
    %29 = arith.mulf %28, %21 : vector<8x128xf32>
    %cst_16 = arith.constant -0.284496725 : f32
    %30 = vector.broadcast %cst_16 : f32 to vector<8x128xf32>
    %31 = arith.addf %29, %30 : vector<8x128xf32>
    %32 = arith.mulf %31, %21 : vector<8x128xf32>
    %cst_17 = arith.constant 0.254829586 : f32
    %33 = vector.broadcast %cst_17 : f32 to vector<8x128xf32>
    %34 = arith.addf %32, %33 : vector<8x128xf32>
    %35 = arith.mulf %34, %21 : vector<8x128xf32>
    %36 = arith.mulf %15, %15 : vector<8x128xf32>
    %cst_18 = arith.constant 0.000000e+00 : f32
    %37 = vector.broadcast %cst_18 : f32 to vector<8x128xf32>
    %38 = arith.subf %37, %36 : vector<8x128xf32>
    %39 = math.exp %38 : vector<8x128xf32>
    %40 = arith.mulf %35, %39 : vector<8x128xf32>
    %cst_19 = arith.constant 1.000000e+00 : f32
    %41 = vector.broadcast %cst_19 : f32 to vector<8x128xf32>
    %42 = arith.subf %41, %40 : vector<8x128xf32>
    %43 = arith.mulf %14, %42 : vector<8x128xf32>
    %cst_20 = arith.constant 1.000000e+00 : f32
    %44 = vector.broadcast %cst_20 : f32 to vector<8x128xf32>
    %45 = arith.addf %44, %43 : vector<8x128xf32>
    %46 = arith.mulf %7, %45 : vector<8x128xf32>
    %c0_21 = arith.constant 0 : index
    %c0_22 = arith.constant 0 : index
    %47 = vector.load %arg4[%c0_21, %c0_22] : memref<128x32xf32, #tpu.memory_space<vmem>>, vector<128x32xf32>
    %cst_23 = arith.constant dense<0.000000e+00> : vector<8x32xf32>
    %48 = tpu.matmul %46, %47, %cst_23 {dimension_numbers = #tpu.dot_dimension_numbers<[1], [0], [0], [1], [0, 0, 1, 1], [], []>} : vector<8x128xf32>, vector<128x32xf32>, vector<8x32xf32> -> vector<8x32xf32>
    %c0_24 = arith.constant 0 : index
    %c0_25 = arith.constant 0 : index
    %49 = vector.load %arg5[%c0_24, %c0_25] : memref<1x32xf32, #tpu.memory_space<vmem>>, vector<1x32xf32>
    %50 = vector.broadcast %49 : vector<1x32xf32> to vector<8x32xf32>
    %51 = arith.addf %48, %50 : vector<8x32xf32>
    %c0_26 = arith.constant 0 : index
    %c0_27 = arith.constant 0 : index
    %52 = vector.load %arg6[%c0_26, %c0_27] : memref<8x32xf32, #tpu.memory_space<vmem>>, vector<8x32xf32>
    tpu.vector_store %arg6[%c0_26, %c0_27], %51 {strides = array<i32>} : memref<8x32xf32, #tpu.memory_space<vmem>>, vector<8x32xf32>,
    return
  }
  func.func @transform_0(%arg0: i32) -> (i32, i32) {
    %c0_i32 = arith.constant 0 : i32
    %c0_i32_0 = arith.constant 0 : i32
    return %arg0, %c0_i32 : i32, i32
  }
  func.func @transform_1(%arg0: i32) -> (i32, i32) {
    %c0_i32 = arith.constant 0 : i32
    %c0_i32_0 = arith.constant 0 : i32
    %c0_i32_1 = arith.constant 0 : i32
    return %c0_i32, %c0_i32_0 : i32, i32
  }
  func.func @transform_2(%arg0: i32) -> (i32, i32) {
    %c0_i32 = arith.constant 0 : i32
    %c0_i32_0 = arith.constant 0 : i32
    %c0_i32_1 = arith.constant 0 : i32
    return %c0_i32, %c0_i32_0 : i32, i32
  }
  func.func @transform_3(%arg0: i32) -> (i32, i32) {
    %c0_i32 = arith.constant 0 : i32
    %c0_i32_0 = arith.constant 0 : i32
    %c0_i32_1 = arith.constant 0 : i32
    return %c0_i32, %c0_i32_0 : i32, i32
  }
  func.func @transform_4(%arg0: i32) -> (i32, i32) {
    %c0_i32 = arith.constant 0 : i32
    %c0_i32_0 = arith.constant 0 : i32
    %c0_i32_1 = arith.constant 0 : i32
    return %c0_i32, %c0_i32_0 : i32, i32
  }
  func.func @transform_5(%arg0: i32) -> (i32, i32) {
    %c0_i32 = arith.constant 0 : i32
    %c0_i32_0 = arith.constant 0 : i32
    return %arg0, %c0_i32 : i32, i32
  }
}

</mosaic_0001>

<bundles_post_ra>
// kernel: tpu_custom_call.1
= control target key start
LH: loop header
LB: loop body
LE: loop exit
PB: predicated region body
PF: predicated region fallthrough
CT: control target
= control target key end

     0   :  { %10 = vsyncpa [#allocation3], 0  ;;  %s714_s0 = inlined_call_operand.vmem [shape: f32[16,32], index: 0, kind: input, shape index: {}]   ;;  %s715_s1 = inlined_call_operand.vmem [shape: f32[32,128], index: 1, kind: input, shape index: {}]   ;;  %s716_s2 = inlined_call_operand.vmem [shape: f32[1,128], index: 2, kind: input, shape index: {}]   ;;  %s717_s3 = inlined_call_operand.vmem [shape: f32[128,32], index: 3, kind: input, shape index: {}]   ;;  %s718_s4 = inlined_call_operand.vmem [shape: f32[1,32], index: 4, kind: input, shape index: {}]   ;;  %s719_s5 = inlined_call_operand.hbm [shape: f32[16,32], index: 5, kind: output, shape index: {}]  }
   0x1   :  { %12 = vsyncpa [#allocation3 + $0x1], 0  ;;  %s561_s18 = smov 0   ;;  %s563_s19 = smov 0  }
   0x2   :  { %s565_s20 = smov 0   ;;  %s567_s21 = smov 0  }
   0x3 LB: > { %s582_s22 = sadd.s32 4294967295, %s528_s21   ;;  %s409_s23 = sadd.s32 4294967294, %s528_s21   ;;  %s528_s21 = sphi %s567_s21, %s725_s21   ;;  %s524_s20 = sphi %s565_s20, %s724_s20   ;;  %s520_s19 = sphi %s563_s19, %s723_s19   ;;  %s516_s18 = sphi %s561_s18, %s722_s18  }
   0x4   : > { %s586_s24 = sadd.s32 1, %s528_s21   ;;  %s135_s25 = sadd.s32 1, %s524_s20 }
   0x5   : > { %s132_s26 = ssub.s32 %s528_s21, %s586_s24  ;;  %p145_p0 = scmp.ne.s32.totalorder %s524_s20, %s520_s19 }
   0x6   : > { %p133_p1 = scmp.eq.s32.totalorder %s132_s26, 0  ;;  %p146_p2 = scmp.eq.s32.totalorder %s582_s22, 1 }
   0x7   : > { %p151_p3 = scmp.ne.s32.totalorder %s520_s19, %s516_s18  ;;  %p152_p4 = scmp.eq.s32.totalorder %s409_s23, 1 }
   0x8   : > { %s597_s27 = scalar_select %p133_p1, %s524_s20, %s135_s25  }
   0x9   : > { %p599_p5 = por %p146_p2, %p145_p0  ;;  %p603_p6 = por %p152_p4, %p151_p3 }
   0xa   : > { %p412_p7 = scmp.ge.s32.totalorder %s528_s21, 1  ;;  %p189_p8 = scmp.lt.s32.totalorder %s528_s21, 3 }
   0xc   : > { %p190_p9 = pnand %p412_p7, %p189_p8 }
   0xd   : > { %p216_p10 = scmp.lt.s32.totalorder (!%p190_p9), %s582_s22, 1  ;;  %s213_s26 = sand.u32 (!%p190_p9), 1, %s520_s19  }
   0xe   : > { %193 = sbr.rel (%p190_p9) target bundleno = 339 (0x153), region = 40  ;;  %s413_s30 = sshll.u32 (!%p190_p9), %s213_s26, 3 }
   0xf   : > { %s417_s6 = sshll.u32 (!%p190_p9), %s582_s22, 3  ;;  %s215_s12 = scalar_lea.vmem (!%p190_p9), [#allocation2], %s413_s30 }
  0x10   : > { %s345_s9 = scalar_lea.hbm (!%p190_p9), %s719_s5, %s417_s6  ;;  %s347_s13 = sshll.u32 (!%p190_p9), %s215_s12, 4  ;;  %s348_s13 = int_to_ptr.vmem [resolvable:$true] %s347_s13 }
  0x11   : > { %s335_s15 = scalar_lea.sflag (!%p190_p9), [#allocation3], %s213_s26  ;;  %s486_s25 = scalar_lea.hbm (!%p190_p9), %s719_s5, 16 }
  0x13   : > { %v224_v0 = vld [vmem:[%s715_s1 + $0x18] sm:$0xff]  ;;  %v223_v1 = vld [vmem:[%s715_s1 + $0x10] sm:$0xff]  ;;  %v222_v2 = vld [vmem:[%s715_s1 + $0x8] sm:$0xff]  ;;  %s217_s11 = scalar_select %p216_p10, %s582_s22, 1  ;;  %vm229_vm0 = vcmask 261120   ;;  %v530_v53 = vmov -1.0  }
  0x14   : > { %245 = vmatpush.msra.mxu0 %v224_v0  ;;  %v221_v3 = vld [vmem:[%s715_s1] sm:$0xff]  ;;  %v308_v5 = vld [vmem:[%s717_s3 + $0x78] sm:$0xff]  ;;  %v307_v6 = vld [vmem:[%s717_s3 + $0x70] sm:$0xff] }
  0x15   : > { %s414_s14 = sshll.u32 %s217_s11, 3  ;;  %313 = vmatpush.msra.mxu1 %v308_v5  ;;  %v306_v7 = vld [vmem:[%s717_s3 + $0x68] sm:$0xff]  ;;  %v305_v8 = vld [vmem:[%s717_s3 + $0x60] sm:$0xff]  ;;  %v304_v9 = vld [vmem:[%s717_s3 + $0x58] sm:$0xff] }
  0x16   : > { %246 = vmatpush.msra.mxu0 %v223_v1  ;;  %s219_s17 = scalar_lea.vmem %s714_s0, %s414_s14  ;;  %v460_v10 = vld [vmem:[%s716_s2] ss:$0 sm:$0xff]  ;;  %v303_v11 = vld [vmem:[%s717_s3 + $0x50] sm:$0xff]  ;;  %v302_v13 = vld [vmem:[%s717_s3 + $0x48] sm:$0xff]  ;;  %s349_s14 = sshll.u32 %s345_s9, 4  ;;  %s350_s14 = int_to_ptr.hbm [resolvable:$true] %s349_s14 }
  0x17   : > { %v220_v4 = vld [vmem:[%s219_s17] sm:$0xff]  ;;  %314 = vmatpush.msra.mxu1 %v307_v6  ;;  %v300_v17 = vld [vmem:[%s717_s3 + $0x38] sm:$0xff]  ;;  %v299_v19 = vld [vmem:[%s717_s3 + $0x30] sm:$0xff]  ;;  %s480_s22 = sshra.s32 %s350_s14, 4  ;;  %s481_s22 = int_to_ptr.hbm [resolvable:$true] %s480_s22 }
  0x18   : > { %247 = vmatpush.msra.mxu0 %v222_v2  ;;  %v301_v15 = vld [vmem:[%s717_s3 + $0x40] sm:$0xff]  ;;  %v298_v21 = vld [vmem:[%s717_s3 + $0x28] sm:$0xff]  ;;  %v296_v24 = vld [vmem:[%s717_s3 + $0x18] sm:$0xff]  ;;  %s482_s16 = scalar_lea.hbm %s481_s22, 8  ;;  %p487_p0 = scmp.lt.s32.totalorder %s481_s22, %s719_s5 }
  0x19   : > { %315 = vmatpush.msra.mxu1 %v306_v7  ;;  %v297_v23 = vld [vmem:[%s717_s3 + $0x20] sm:$0xff]  ;;  %v295_v25 = vld [vmem:[%s717_s3 + $0x10] sm:$0xff]  ;;  %v294_v26 = vld [vmem:[%s717_s3 + $0x8] sm:$0xff]  ;;  %p483_p11 = scmp.ne.s32.totalorder %s481_s22, %s482_s16  ;;  %p488_p1 = scmp.lt.s32.totalorder %s486_s25, %s482_s16 }
  0x1a   : > { %248 = vmatpush.msra.mxu0 %v221_v3  ;;  %v293_v29 = vld [vmem:[%s717_s3] sm:$0xff] }
  0x1b   : > { %415 = vmatmul.msk.f32.vlgmr.msra.gmra.mxu0 %vm229_vm0, %v220_v4  ;;  %316 = vmatpush.msra.mxu1 %v305_v8  ;;  %v461_v59 = vld [vmem:[%s718_s4] ss:$0 sm:$0xff]  ;;  %p484_p12 = pnand %p483_p11, %p599_p5  ;;  %p489_p2 = por %p488_p1, %p487_p0 }
  0x1d   : > { %317 = vmatpush.msra.mxu1 %v304_v9  ;;  %p485_p13 = pneg %p484_p12 }
  0x1f   : > { %318 = vmatpush.msra.mxu1 %v303_v11  ;;  %p490_p3 = pnand %p489_p2, %p485_p13 }
  0x21   : > { %319 = vmatpush.msra.mxu1 %v302_v13 }
  0x23   : > { %320 = vmatpush.msra.mxu1 %v301_v15 }
  0x25   : > { %321 = vmatpush.msra.mxu1 %v300_v17 }
  0x27   : > { %322 = vmatpush.msra.mxu1 %v299_v19 }
  0x29   : > { %323 = vmatpush.msra.mxu1 %v298_v21 }
  0x2b   : > { %324 = vmatpush.msra.mxu1 %v297_v23 }
  0x2d   : > { %325 = vmatpush.msra.mxu1 %v296_v24 }
  0x2f   : > { %326 = vmatpush.msra.mxu1 %v295_v25 }
  0x31   : > { %327 = vmatpush.msra.mxu1 %v294_v26 }
  0x33   : > { %328 = vmatpush.msra.mxu1 %v293_v29 }
  0x98   : > { %v250_v12 = vpop.f32.mrf.mxu0 }
  0x99   : > { %v251_v14 = vadd.f32 %v460_v10, %v250_v12 }
  0x9b   : > { %v254_v16 = vmul.f32 0.70710677, %v251_v14  ;;  %v253_v56 = vmul.f32 0.5, %v251_v14 }
  0x9d   : > { %v257_v18 = vand.u32 2147483647, %v254_v16  ;;  %vm255_vm5 = vcmp.ge.f32.partialorder %v254_v16, 0.0 }
  0x9e   : > { %v256_v54 = vsel %vm255_vm5, 1.0, %v530_v53 }
  0x9f   : > { %v258_v20 = vmul.f32 0.3275911, %v257_v18  ;;  %v284_v37 = vmul.f32 %v257_v18, %v257_v18 }
  0xa1   : > { %v259_v22 = vadd.f32 1.0, %v258_v20  ;;  %v285_v41 = vsub.f32 0.0, %v284_v37 }
  0xa3   : > { %462 = vrcp.f32 %v259_v22  ;;  %v271_v31 = vand.u32 2147483648, %v259_v22  ;;  %v269_v33 = vand.u32 2147483647, %v259_v22  ;;  %vm265_vm2 = vweird.f32 %v259_v22 }
  0xa4   : > { %v286_v44 = vmul.f32 1.442695, %v285_v41 }
  0xa5   : > { %v272_v35 = vor.u32 1.1754944e-38, %v271_v31  ;;  %vm270_vm4 = vcmp.eq.f32.partialorder %v269_v33, 8.507059e+37 }
  0xa6   : > { %464 = vpow2.f32 %v286_v44 }
  0xa9   : > { %v463_v27 = vpop.eup %462 }
  0xaa   : > { %v261_v28 = vmul.f32 %v463_v27, %v259_v22  ;;  %vm266_vm1 = vweird.f32 %v463_v27 }
  0xab   : > { %vm267_vm3 = vmor %vm265_vm2, %vm266_vm1 }
  0xac   : > { %v262_v30 = vsub.f32 1.0, %v261_v28  ;;  %v465_v50 = vpop.eup %464 }
  0xae   : > { %v263_v32 = vmul.f32 %v463_v27, %v262_v30 }
  0xb0   : > { %v264_v34 = vadd.f32 %v463_v27, %v263_v32 }
  0xb2   : > { %v268_v36 = vsel %vm267_vm3, %v463_v27, %v264_v34 }
  0xb3   : > { %v273_v38 = vsel %vm270_vm4, %v272_v35, %v268_v36 }
  0xb4   : > { %v275_v39 = vmul.f32 1.0614054, %v273_v38 }
  0xb6   : > { %v276_v40 = vadd.f32 -1.4531521, %v275_v39 }
  0xb8   : > { %v277_v42 = vmul.f32 %v276_v40, %v273_v38 }
  0xba   : > { %v278_v43 = vadd.f32 1.4214138, %v277_v42 }
  0xbc   : > { %v279_v45 = vmul.f32 %v278_v43, %v273_v38 }
  0xbe   : > { %v280_v46 = vadd.f32 -0.28449672, %v279_v45 }
  0xc0   : > { %v281_v47 = vmul.f32 %v280_v46, %v273_v38 }
  0xc2   : > { %v282_v48 = vadd.f32 0.2548296, %v281_v47 }
  0xc4   : > { %v283_v49 = vmul.f32 %v282_v48, %v273_v38 }
  0xc6   : > { %v288_v51 = vmul.f32 %v465_v50, %v283_v49 }
  0xc8   : > { %v289_v52 = vsub.f32 1.0, %v288_v51 }
  0xca   : > { %v290_v55 = vmul.f32 %v289_v52, %v256_v54 }
  0xcc   : > { %v291_v57 = vadd.f32 1.0, %v290_v55 }
  0xce   : > { %v292_v58 = vmul.f32 %v291_v57, %v253_v56 }
  0xd0   : > { %329 = vmatmul.f32.vlgmr.msra.gmra.mxu1 %v292_v58 }
 0x14d   : > { %v330_v60 = vpop.f32.mrf.mxu1 }
 0x14e   : > { %v331_v61 = vadd.f32 %v461_v59, %v330_v60 }
 0x150   : > { %333 = vst.msk [vmem:[%s215_s12] sm:$0xff] %vm229_vm0, %v331_v61 }
 0x151   : > { %493 = shalt.err (!%p490_p3)
}
 0x152   : > { %420 = dma.vmem_to_hbm [thread:$0]  (%p599_p5), %s348_s13, 128, %s350_s14, %s335_s15  }
 0x153 PF: > { %p426_p4 = scmp.ge.s32.totalorder %s528_s21, 2  ;;  %s361_s26 = sand.u32 1, %s516_s18  }
 0x154   : > { %s362_s7 = scalar_lea.sflag [#allocation3], %s361_s26 }
 0x155   : > { %p423_p7 = pnand %p426_p4, %p603_p6 }
 0x157   : > { %p424_p8 = pneg %p423_p7 }
 0x159   : > { %511 = dma.done.wait (%p424_p8), %s362_s7, 128  }
 0x15a   : > { %513 = vsyncadd (%p424_p8), %s362_s7, 4294967168  ;;  %p15_p9 = scmp.ge.s32.totalorder %s586_s24, 4   ;;  %s722_s18 = smov %s520_s19 }
 0x15b   : > { %s723_s19 = smov %s524_s20  ;;  %s724_s20 = smov %s597_s27 }
 0x15c   : > { %s725_s21 = smov %s586_s24  ;;  %17 = sbr.rel (!%p15_p9) target bundleno = 3 (0x3), region = 75 }
 0x161   :  { %368 = vsyncpa [#allocation3], 1 }
 0x162   :  { %370 = vsyncpa [#allocation3 + $0x1], 1 }

</bundles_post_ra>
